<compile_context>
chip_gen: v5e
topology: v5e:2x2
jax: 0.10.0
libtpu: 0.0.40
codegen_flags: <defaults>
</compile_context>

<pallas_src>
import math

import jax
import jax.numpy as jnp
import numpy as np
from jax.experimental import pallas as pl
from jax.experimental.pallas import tpu as pltpu


# ---------------------------------------------------------------------------
# exact-GELU helper (nn.GELU default is the erf form).
# Mosaic has no guaranteed erf lowering, so erf uses the Abramowitz&Stegun
# 7.1.26 rational approximation (|err| < 1.5e-7 ~ f32).  exp and the
# reciprocal land on the EUP slot; the polynomial is VPU work.
# NOTE: reciprocal kept approx=False so GELU stays inside the 3e-5 validation
# tolerance; on v5e approx=True shaves the Newton-refinement VALU ops if a
# ~1e-4 GELU error budget is acceptable.
# ---------------------------------------------------------------------------
def _erf(z):
    a1, a2, a3, a4, a5 = (0.254829592, -0.284496736, 1.421413741,
                          -1.453152027, 1.061405429)
    p = 0.3275911
    sgn = jnp.where(z >= 0, 1.0, -1.0)
    za = jnp.abs(z)
    t = pl.reciprocal(1.0 + p * za, approx=False)            # EUP
    poly = ((((a5 * t + a4) * t + a3) * t + a2) * t + a1) * t
    return sgn * (1.0 - poly * jnp.exp(-za * za))             # exp -> EUP


def _gelu_exact(x):
    return 0.5 * x * (1.0 + _erf(x * (1.0 / math.sqrt(2.0))))


# ---------------------------------------------------------------------------
# static shape / tiling helpers
# ---------------------------------------------------------------------------
def _derive_dims(L, stride, n):
    L_out = (L - 1) // stride + 1            # identical for every branch
    max_pad = stride + n - 2                 # largest branch padding
    K_max = 2 * n + 2 * stride - 3           # union of all branch tap offsets
    Lq = -(-(L + 2 * max_pad) // stride)     # padded length per stride-phase
    Lq = -(-Lq // 8) * 8                     # sublane-align: free in-kernel reshapes
    return L_out, max_pad, K_max, Lq


def _pick_batch_tile(B, L_out, target_rows=512):
    """Batch elements per pass-1 grid step.

    Big lane-dense slabs (>= ~512 rows of the (rows, d_out) problem) amortize
    the ~0.35us per-grid-step overhead; Bt divides B so every slab has the
    same row count (keeps BN partial combination trivial) and at realistic B
    there are still multiple `parallel` steps for v7x megacore.
    """
    bt = max(1, min(B, max(1, target_rows // max(1, L_out))))
    while B % bt != 0:
        bt -= 1
    return bt


def _pick_row_tile(rows, target=1024):
    """Row tile for pass 2 over the flattened (B*L_out, d_out) tensor."""
    if rows <= target:
        return rows
    rt = target - (target % 8)
    while rt >= 8:
        if rows % rt == 0:
            return rt
        rt -= 8
    return rows                              # fallback: single full-extent block


def _vmem_limit_bytes(per_step_bytes):
    """Scoped-VMEM budget from actual block bytes, capped per generation."""
    try:
        cap = int(pltpu.get_tpu_info().vmem_capacity_bytes)   # 64 MiB v7x, 128 MiB v5e/v6e
    except Exception:
        cap = 64 * 1024 * 1024                                # conservative fallback
    want = 3 * per_step_bytes + (8 << 20)                     # double-buffered DMAs + headroom
    return int(max(16 << 20, min(want, (cap * 3) // 4)))


# ---------------------------------------------------------------------------
# pass 1: pointwise conv (MXU) + fused depthwise branches + per-slab BN stats
# ---------------------------------------------------------------------------
def make_conv_stats_kernel(Bt, L, C_in, d_out, stride, n):
    L_out, max_pad, K_max, Lq = _derive_dims(L, stride, n)

    def kernel(xph_ref, w1_ref, b1_ref, wc_ref,
               z_ref, bmean_ref, bm2_ref, y1ph_ref):
        # xph_ref : (Bt, stride, Lq, C_in)   phase-deinterleaved, zero-padded x
        # w1_ref  : (C_in, d_out)            conv1 weight replicated over branches
        # b1_ref  : (1, d_out)               conv1 bias   replicated over branches
        # wc_ref  : (K_max, d_out)           combined depthwise weight table
        # z_ref   : (Bt, L_out, d_out)       pre-BN output slab
        # bmean/bm2_ref : (1, 1, d_out)      per-slab BN partials
        # y1ph_ref: VMEM (stride, Bt, Lq, d_out) scratch (phase-major conv1 out)

        # ---- pointwise conv1: ONE MXU matmul over the whole slab (replaces
        # the C_in-pass VALU broadcast-MAC loop).  Lq % 8 == 0 makes the
        # reshapes layout-preserving.
        xs = xph_ref[...].reshape(Bt * stride * Lq, C_in)
        ys = jnp.dot(xs, w1_ref[...], preferred_element_type=jnp.float32)
        ys = (ys + b1_ref[...]).reshape(Bt, stride, Lq, d_out)

        # PyTorch zero-pads AFTER conv1+bias, so padded positions of the
        # conv1 output must be exactly 0 -> cheap 2-D iota mask per phase.
        q = jax.lax.broadcasted_iota(jnp.int32, (Lq, 1), 0)
        for s in range(stride):                               # static (stride = 2)
            pos = q * stride + s
            valid = jnp.logical_and(pos >= max_pad, pos < max_pad + L)  # (Lq, 1)
            y1ph_ref[s] = jnp.where(valid, ys[:, s], 0.0)     # (Bt, Lq, d_out)

        # ---- all n depthwise branches fused: K_max unit-stride taps over the
        # phase buffers, accumulated at full d_out lane width.
        # TODO(synk): for large L_out additionally tile L_out (halo of
        # K_max//stride rows on y1ph) so the `acc` live range stays inside the
        # 64-vreg file; at the shapes used here the 9-tap unroll is tiny.
        acc = jnp.zeros((Bt, L_out, d_out), jnp.float32)
        for u in range(K_max):                                # static unroll (9 taps)
            s_u, q_u = u % stride, u // stride
            seg = y1ph_ref[s_u, :, q_u:q_u + L_out, :]        # (Bt, L_out, d_out)
            acc = acc + seg * wc_ref[u:u + 1, :]
        z_ref[...] = acc                                      # one wide store

        # ---- BN partials around the slab-local mean (stable: no E[x^2]-E[x]^2
        # cancellation); combined across slabs in the wrapper (Chan).
        inv_cnt = 1.0 / float(Bt * L_out)
        m = jnp.sum(jnp.sum(acc, axis=0), axis=0, keepdims=True) * inv_cnt  # (1, d_out)
        dlt = acc - m
        m2 = jnp.sum(jnp.sum(dlt * dlt, axis=0), axis=0, keepdims=True)     # (1, d_out)
        bmean_ref[...] = m.reshape(1, 1, d_out)
        bm2_ref[...] = m2.reshape(1, 1, d_out)

    return kernel


# ---------------------------------------------------------------------------
# pass 2: BatchNorm apply (pre-folded scale/shift) + GELU, elementwise
# ---------------------------------------------------------------------------
def bn_gelu_kernel(z_ref, scale_ref, shift_ref, o_ref):
    o_ref[...] = _gelu_exact(z_ref[...] * scale_ref[...] + shift_ref[...])


# ---------------------------------------------------------------------------
# wrapper
# ---------------------------------------------------------------------------
def embedding_forward(x_ncl, params, *, stride=2, n=4):
    """x_ncl: (B, d_in, L) float32 (PyTorch NCL).  Returns (B, d_out, L_out)."""
    B, C_in, L = x_ncl.shape
    w1 = params["w1"]            # (H, C_in)   -- PyTorch (H, C_in, 1) squeezed
    b1 = params["b1"]            # (1, H)
    wds = params["wd"]           # list of (H, k_i) -- PyTorch (H, 1, k_i) squeezed
    gamma = params["gamma"]      # (1, d_out)
    beta = params["beta"]        # (1, d_out)
    H = w1.shape[0]
    d_out = gamma.shape[1]
    assert d_out == n * H
    L_out, max_pad, K_max, Lq = _derive_dims(L, stride, n)
    eps = 1e-5
    f32 = jnp.float32

    # ---- wrapper-side layout plumbing (pure pad/reshape/transpose) ----------
    # Deinterleave x into `stride` phases once so every in-kernel tap is a
    # unit-stride read; replicate conv1 weights across the n branch groups so
    # the whole kernel runs d_out lanes wide.
    x_blc = jnp.transpose(x_ncl, (0, 2, 1)).astype(f32)               # (B, L, C_in)
    pad_right = Lq * stride - (L + max_pad)
    xp = jnp.pad(x_blc, ((0, 0), (max_pad, pad_right), (0, 0)))
    x_phase = jnp.transpose(xp.reshape(B, Lq, stride, C_in),
                            (0, 2, 1, 3))                             # (B, stride, Lq, C_in)

    # TODO(synk): for large d_out on v7x (64 MiB VMEM), keep the conv1 scratch
    # at width H instead of replicating n-fold and widen only at the tap stage.
    w1rep = jnp.tile(jnp.transpose(w1, (1, 0)).astype(f32), (1, n))   # (C_in, d_out)
    b1rep = jnp.tile(b1.astype(f32), (1, n))                          # (1, d_out)

    # Combined depthwise weight table: branch i tap t lives at absolute offset
    # u = t + (n-1-i) inside the shared K_max-tap window; zero elsewhere.
    wc = jnp.zeros((K_max, d_out), f32)
    for i in range(n):
        k_i = 2 * i + 2 * stride - 1
        off = n - 1 - i
        wc = wc.at[off:off + k_i, i * H:(i + 1) * H].set(
            jnp.transpose(wds[i], (1, 0)).astype(f32))

    # ---- pass 1: conv1 + fused depthwise branches + per-slab BN stats -------
    Bt = _pick_batch_tile(B, L_out)
    nb = B // Bt

    blk1_bytes = 4 * (Bt * stride * Lq * C_in        # x_phase block
                      + Bt * stride * Lq * d_out     # y1ph scratch
                      + Bt * L_out * d_out           # z block
                      + (C_in + 1 + K_max + 2) * d_out)
    cp1 = pltpu.CompilerParams(
        dimension_semantics=("parallel",),
        vmem_limit_bytes=_vmem_limit_bytes(blk1_bytes),
    )

    conv_kernel = make_conv_stats_kernel(Bt, L, C_in, d_out, stride, n)
    z, bmean, bm2 = pl.pallas_call(
        conv_kernel,
        out_shape=(jax.ShapeDtypeStruct((B, L_out, d_out), f32),
                   jax.ShapeDtypeStruct((nb, 1, d_out), f32),
                   jax.ShapeDtypeStruct((nb, 1, d_out), f32)),
        grid_spec=pltpu.PrefetchScalarGridSpec(
            num_scalar_prefetch=0,
            grid=(nb,),
            in_specs=[
                pl.BlockSpec((Bt, stride, Lq, C_in), lambda b: (b, 0, 0, 0)),
                pl.BlockSpec((C_in, d_out), lambda b: (0, 0)),
                pl.BlockSpec((1, d_out), lambda b: (0, 0)),
                pl.BlockSpec((K_max, d_out), lambda b: (0, 0)),
            ],
            out_specs=[
                pl.BlockSpec((Bt, L_out, d_out), lambda b: (b, 0, 0)),
                pl.BlockSpec((1, 1, d_out), lambda b: (b, 0, 0)),
                pl.BlockSpec((1, 1, d_out), lambda b: (b, 0, 0)),
            ],
            scratch_shapes=[pltpu.VMEM((stride, Bt, Lq, d_out), f32)],
        ),
        compiler_params=cp1,
    )(x_phase, w1rep, b1rep, wc)

    # ---- combine per-slab statistics (Chan's parallel variance; tiny math) --
    N = float(B * L_out)
    cnt_blk = float(Bt * L_out)
    mean = jnp.mean(bmean, axis=0)                          # (1, d_out) (equal slab counts)
    m2 = jnp.sum(bm2, axis=0) + cnt_blk * jnp.sum((bmean - mean) ** 2, axis=0)
    var = m2 / N                                            # biased (training-mode BN)
    scale = gamma.astype(f32) * jax.lax.rsqrt(var + eps)
    shift = beta.astype(f32) - mean * scale

    # ---- pass 2: BN apply + GELU over flattened (B*L_out, d_out) row tiles --
    # TODO(synk): store z in bf16 between passes to halve inter-pass HBM
    # traffic (needs a ~1e-3 validation tolerance); kept f32 here.
    # TODO(synk): when L_out % 128 == 0, emit NCL (B, d_out, L_out) directly
    # from this kernel to skip the final XLA transpose round trip.
    rows = B * L_out
    RT = _pick_row_tile(rows)
    z_flat = z.reshape(rows, d_out)
    blk2_bytes = 4 * (2 * RT * d_out + 2 * d_out)
    cp2 = pltpu.CompilerParams(
        dimension_semantics=("parallel",),
        vmem_limit_bytes=_vmem_limit_bytes(blk2_bytes),
    )
    out_flat = pl.pallas_call(
        bn_gelu_kernel,
        out_shape=jax.ShapeDtypeStruct((rows, d_out), f32),
        grid_spec=pltpu.PrefetchScalarGridSpec(
            num_scalar_prefetch=0,
            grid=(rows // RT,),
            in_specs=[
                pl.BlockSpec((RT, d_out), lambda r: (r, 0)),
                pl.BlockSpec((1, d_out), lambda r: (0, 0)),
                pl.BlockSpec((1, d_out), lambda r: (0, 0)),
            ],
            out_specs=pl.BlockSpec((RT, d_out), lambda r: (r, 0)),
        ),
        compiler_params=cp2,
    )(z_flat, scale, shift)

    return jnp.transpose(out_flat.reshape(B, L_out, d_out), (0, 2, 1))  # NCL


# ---------------------------------------------------------------------------
# pure-JAX reference (for validation only)
# ---------------------------------------------------------------------------
def embedding_reference(x_ncl, params, *, stride=2, n=4):
    B, C_in, L = x_ncl.shape
    w1, b1 = params["w1"], params["b1"]
    max_pad = stride + n - 2
    L_out = (L - 1) // stride + 1

    x = jnp.transpose(x_ncl, (0, 2, 1))                   # (B, L, C_in)
    y1 = jnp.einsum("blc,hc->blh", x, w1) + b1            # (B, L, H)
    y1p = jnp.pad(y1, ((0, 0), (max_pad, max_pad), (0, 0)))

    outs = []
    for i in range(n):
        k = 2 * i + 2 * stride - 1
        wd = params["wd"][i]                               # (H, k)
        start = n - 1 - i
        acc = jnp.zeros((B, L_out, y1.shape[-1]), jnp.float32)
        for t in range(k):
            seg = y1p[:, start + t: start + t + stride * L_out: stride, :]
            acc = acc + seg * wd[:, t][None, None, :]
        outs.append(acc)
    y = jnp.concatenate(outs, axis=-1)                     # (B, L_out, d_out)

    mean = jnp.mean(y, axis=(0, 1), keepdims=True)
    var = jnp.mean((y - mean) ** 2, axis=(0, 1), keepdims=True)
    y = (y - mean) / jnp.sqrt(var + 1e-5) * params["gamma"] + params["beta"]
    y = 0.5 * y * (1.0 + jax.scipy.special.erf(y / jnp.sqrt(2.0)))
    return jnp.transpose(y, (0, 2, 1))


# ---------------------------------------------------------------------------
if __name__ == "__main__":
    B, d_in, L = 2, 4, 16
    d_out, n, stride = 32, 4, 2
    H = d_out // n
    L_out = (L - 1) // stride + 1

    key = jax.random.PRNGKey(0)
    keys = jax.random.split(key, 5 + n)
    x = jax.random.normal(keys[0], (B, d_in, L), jnp.float32)
    w1 = jax.random.normal(keys[1], (H, d_in), jnp.float32) * 0.3
    b1 = jax.random.normal(keys[2], (1, H), jnp.float32) * 0.1
    wds = [jax.random.normal(keys[3 + i], (H, 2 * i + 2 * stride - 1), jnp.float32) * 0.3
           for i in range(n)]
    gamma = 1.0 + 0.1 * jax.random.normal(keys[3 + n], (1, d_out), jnp.float32)
    beta = 0.1 * jax.random.normal(keys[4 + n], (1, d_out), jnp.float32)
    params = dict(w1=w1, b1=b1, wd=wds, gamma=gamma, beta=beta)

    out = embedding_forward(x, params, stride=stride, n=n)
    out = jax.block_until_ready(out)
    assert out.shape == (B, d_out, L_out), out.shape

    ref = embedding_reference(x, params, stride=stride, n=n)
    np.testing.assert_allclose(np.asarray(out), np.asarray(ref), atol=3e-5, rtol=3e-5)

    print("KERNEL_OK")
</pallas_src>

<mosaic_0001>
module attributes {stable_mosaic.version = 11 : i64} {
  func.func @kernel(%arg0: i32, %arg1: memref<2x2x16x4xf32, #tpu.memory_space<vmem>>, %arg2: memref<4x32xf32, #tpu.memory_space<vmem>>, %arg3: memref<1x32xf32, #tpu.memory_space<vmem>>, %arg4: memref<9x32xf32, #tpu.memory_space<vmem>>, %arg5: memref<2x8x32xf32, #tpu.memory_space<vmem>>, %arg6: memref<1x1x32xf32, #tpu.memory_space<vmem>>, %arg7: memref<1x1x32xf32, #tpu.memory_space<vmem>>, %arg8: memref<2x2x16x32xf32, #tpu.memory_space<vmem>>) attributes {dimension_semantics = [#tpu.dimension_semantics<parallel>], iteration_bounds = array<i64: 1>, scalar_prefetch = 0 : i64, scratch_operands = 1 : i64, tpu.core_type = #tpu.core_type<tc>, window_params = [{transform_indices = @transform_0, window_bounds = array<i64: 2, 2, 16, 4>}, {pipeline_mode = #tpu.pipeline_mode<synchronous>, transform_indices = @transform_1, window_bounds = array<i64: 4, 32>}, {pipeline_mode = #tpu.pipeline_mode<synchronous>, transform_indices = @transform_2, window_bounds = array<i64: 1, 32>}, {pipeline_mode = #tpu.pipeline_mode<synchronous>, transform_indices = @transform_3, window_bounds = array<i64: 9, 32>}, {transform_indices = @transform_4, window_bounds = array<i64: 2, 8, 32>}, {transform_indices = @transform_5, window_bounds = array<i64: 1, 1, 32>}, {transform_indices = @transform_6, window_bounds = array<i64: 1, 1, 32>}]} {
    %c0 = arith.constant 0 : index
    %c0_0 = arith.constant 0 : index
    %c0_1 = arith.constant 0 : index
    %c0_2 = arith.constant 0 : index
    %0 = vector.load %arg1[%c0, %c0_0, %c0_1, %c0_2] : memref<2x2x16x4xf32, #tpu.memory_space<vmem>>, vector<2x2x16x4xf32>
    %1 = vector.shape_cast %0 : vector<2x2x16x4xf32> to vector<64x4xf32>
    %c0_3 = arith.constant 0 : index
    %c0_4 = arith.constant 0 : index
    %2 = vector.load %arg2[%c0_3, %c0_4] : memref<4x32xf32, #tpu.memory_space<vmem>>, vector<4x32xf32>
    %cst = arith.constant dense<0.000000e+00> : vector<64x32xf32>
    %3 = tpu.matmul %1, %2, %cst {dimension_numbers = #tpu.dot_dimension_numbers<[1], [0], [0], [1], [0, 0, 1, 1], [], []>} : vector<64x4xf32>, vector<4x32xf32>, vector<64x32xf32> -> vector<64x32xf32>
    %c0_5 = arith.constant 0 : index
    %c0_6 = arith.constant 0 : index
    %4 = vector.load %arg3[%c0_5, %c0_6] : memref<1x32xf32, #tpu.memory_space<vmem>>, vector<1x32xf32>
    %5 = vector.broadcast %4 : vector<1x32xf32> to vector<64x32xf32>
    %6 = arith.addf %3, %5 : vector<64x32xf32>
    %7 = vector.shape_cast %6 : vector<64x32xf32> to vector<2x2x16x32xf32>
    %8 = tpu.iota {dimensions = array<i32: 0>} : vector<16x1xi32>
    %c2_i32 = arith.constant 2 : i32
    %9 = vector.broadcast %c2_i32 : i32 to vector<16x1xi32>
    %10 = arith.muli %8, %9 : vector<16x1xi32>
    %c0_i32 = arith.constant 0 : i32
    %11 = vector.broadcast %c0_i32 : i32 to vector<16x1xi32>
    %12 = arith.addi %10, %11 : vector<16x1xi32>
    %c4_i32 = arith.constant 4 : i32
    %13 = vector.broadcast %c4_i32 : i32 to vector<16x1xi32>
    %14 = arith.cmpi sge, %12, %13 : vector<16x1xi32>
    %c20_i32 = arith.constant 20 : i32
    %15 = vector.broadcast %c20_i32 : i32 to vector<16x1xi32>
    %16 = arith.cmpi slt, %12, %15 : vector<16x1xi32>
    %17 = arith.andi %14, %16 : vector<16x1xi1>
    %18 = vector.extract_strided_slice %7 {offsets = [0, 0, 0, 0], sizes = [2, 1, 16, 32], strides = [1, 1, 1, 1]} : vector<2x2x16x32xf32> to vector<2x1x16x32xf32>
    %19 = vector.shape_cast %18 : vector<2x1x16x32xf32> to vector<2x16x32xf32>
    %cst_7 = arith.constant 0.000000e+00 : f32
    %20 = vector.shape_cast %17 : vector<16x1xi1> to vector<1x16x1xi1>
    %21 = vector.broadcast %20 : vector<1x16x1xi1> to vector<2x16x32xi1>
    %22 = vector.broadcast %cst_7 : f32 to vector<2x16x32xf32>
    %23 = arith.select %21, %19, %22 : vector<2x16x32xi1>, vector<2x16x32xf32>
    %c0_8 = arith.constant 0 : index
    %c0_9 = arith.constant 0 : index
    %c0_10 = arith.constant 0 : index
    %c0_11 = arith.constant 0 : index
    %24 = vector.load %arg8[%c0_8, %c0_9, %c0_10, %c0_11] : memref<2x2x16x32xf32, #tpu.memory_space<vmem>>, vector<1x2x16x32xf32>
    %25 = vector.shape_cast %24 : vector<1x2x16x32xf32> to vector<2x16x32xf32>
    %26 = vector.shape_cast %23 : vector<2x16x32xf32> to vector<1x2x16x32xf32>
    tpu.vector_store %arg8[%c0_8, %c0_9, %c0_10, %c0_11], %26 {strides = array<i32>} : memref<2x2x16x32xf32, #tpu.memory_space<vmem>>, vector<1x2x16x32xf32>,
    %c2_i32_12 = arith.constant 2 : i32
    %27 = vector.broadcast %c2_i32_12 : i32 to vector<16x1xi32>
    %28 = arith.muli %8, %27 : vector<16x1xi32>
    %c1_i32 = arith.constant 1 : i32
    %29 = vector.broadcast %c1_i32 : i32 to vector<16x1xi32>
    %30 = arith.addi %28, %29 : vector<16x1xi32>
    %c4_i32_13 = arith.constant 4 : i32
    %31 = vector.broadcast %c4_i32_13 : i32 to vector<16x1xi32>
    %32 = arith.cmpi sge, %30, %31 : vector<16x1xi32>
    %c20_i32_14 = arith.constant 20 : i32
    %33 = vector.broadcast %c20_i32_14 : i32 to vector<16x1xi32>
    %34 = arith.cmpi slt, %30, %33 : vector<16x1xi32>
    %35 = arith.andi %32, %34 : vector<16x1xi1>
    %36 = vector.extract_strided_slice %7 {offsets = [0, 1, 0, 0], sizes = [2, 1, 16, 32], strides = [1, 1, 1, 1]} : vector<2x2x16x32xf32> to vector<2x1x16x32xf32>
    %37 = vector.shape_cast %36 : vector<2x1x16x32xf32> to vector<2x16x32xf32>
    %cst_15 = arith.constant 0.000000e+00 : f32
    %38 = vector.shape_cast %35 : vector<16x1xi1> to vector<1x16x1xi1>
    %39 = vector.broadcast %38 : vector<1x16x1xi1> to vector<2x16x32xi1>
    %40 = vector.broadcast %cst_15 : f32 to vector<2x16x32xf32>
    %41 = arith.select %39, %37, %40 : vector<2x16x32xi1>, vector<2x16x32xf32>
    %c1 = arith.constant 1 : index
    %c0_16 = arith.constant 0 : index
    %c0_17 = arith.constant 0 : index
    %c0_18 = arith.constant 0 : index
    %42 = vector.load %arg8[%c1, %c0_16, %c0_17, %c0_18] : memref<2x2x16x32xf32, #tpu.memory_space<vmem>>, vector<1x2x16x32xf32>
    %43 = vector.shape_cast %42 : vector<1x2x16x32xf32> to vector<2x16x32xf32>
    %44 = vector.shape_cast %41 : vector<2x16x32xf32> to vector<1x2x16x32xf32>
    tpu.vector_store %arg8[%c1, %c0_16, %c0_17, %c0_18], %44 {strides = array<i32>} : memref<2x2x16x32xf32, #tpu.memory_space<vmem>>, vector<1x2x16x32xf32>,
    %cst_19 = arith.constant 0.000000e+00 : f32
    %45 = vector.broadcast %cst_19 : f32 to vector<2x8x32xf32>
    %c0_20 = arith.constant 0 : index
    %c0_21 = arith.constant 0 : index
    %c0_22 = arith.constant 0 : index
    %c0_23 = arith.constant 0 : index
    %46 = vector.load %arg8[%c0_20, %c0_21, %c0_22, %c0_23] : memref<2x2x16x32xf32, #tpu.memory_space<vmem>>, vector<1x2x8x32xf32>
    %47 = vector.shape_cast %46 : vector<1x2x8x32xf32> to vector<2x8x32xf32>
    %c0_24 = arith.constant 0 : index
    %c0_25 = arith.constant 0 : index
    %48 = vector.load %arg4[%c0_24, %c0_25] : memref<9x32xf32, #tpu.memory_space<vmem>>, vector<1x32xf32>
    %49 = vector.shape_cast %48 : vector<1x32xf32> to vector<1x1x32xf32>
    %50 = vector.broadcast %49 : vector<1x1x32xf32> to vector<2x8x32xf32>
    %51 = arith.mulf %47, %50 : vector<2x8x32xf32>
    %52 = arith.addf %45, %51 : vector<2x8x32xf32>
    %c1_26 = arith.constant 1 : index
    %c0_27 = arith.constant 0 : index
    %c0_28 = arith.constant 0 : index
    %c0_29 = arith.constant 0 : index
    %53 = vector.load %arg8[%c1_26, %c0_27, %c0_28, %c0_29] : memref<2x2x16x32xf32, #tpu.memory_space<vmem>>, vector<1x2x8x32xf32>
    %54 = vector.shape_cast %53 : vector<1x2x8x32xf32> to vector<2x8x32xf32>
    %c1_30 = arith.constant 1 : index
    %c0_31 = arith.constant 0 : index
    %55 = vector.load %arg4[%c1_30, %c0_31] : memref<9x32xf32, #tpu.memory_space<vmem>>, vector<1x32xf32>
    %56 = vector.shape_cast %55 : vector<1x32xf32> to vector<1x1x32xf32>
    %57 = vector.broadcast %56 : vector<1x1x32xf32> to vector<2x8x32xf32>
    %58 = arith.mulf %54, %57 : vector<2x8x32xf32>
    %59 = arith.addf %52, %58 : vector<2x8x32xf32>
    %c0_32 = arith.constant 0 : index
    %c0_33 = arith.constant 0 : index
    %c1_34 = arith.constant 1 : index
    %c0_35 = arith.constant 0 : index
    %60 = vector.load %arg8[%c0_32, %c0_33, %c1_34, %c0_35] : memref<2x2x16x32xf32, #tpu.memory_space<vmem>>, vector<1x2x8x32xf32>
    %61 = vector.shape_cast %60 : vector<1x2x8x32xf32> to vector<2x8x32xf32>
    %c2 = arith.constant 2 : index
    %c0_36 = arith.constant 0 : index
    %62 = vector.load %arg4[%c2, %c0_36] : memref<9x32xf32, #tpu.memory_space<vmem>>, vector<1x32xf32>
    %63 = vector.shape_cast %62 : vector<1x32xf32> to vector<1x1x32xf32>
    %64 = vector.broadcast %63 : vector<1x1x32xf32> to vector<2x8x32xf32>
    %65 = arith.mulf %61, %64 : vector<2x8x32xf32>
    %66 = arith.addf %59, %65 : vector<2x8x32xf32>
    %c1_37 = arith.constant 1 : index
    %c0_38 = arith.constant 0 : index
    %c1_39 = arith.constant 1 : index
    %c0_40 = arith.constant 0 : index
    %67 = vector.load %arg8[%c1_37, %c0_38, %c1_39, %c0_40] : memref<2x2x16x32xf32, #tpu.memory_space<vmem>>, vector<1x2x8x32xf32>
    %68 = vector.shape_cast %67 : vector<1x2x8x32xf32> to vector<2x8x32xf32>
    %c3 = arith.constant 3 : index
    %c0_41 = arith.constant 0 : index
    %69 = vector.load %arg4[%c3, %c0_41] : memref<9x32xf32, #tpu.memory_space<vmem>>, vector<1x32xf32>
    %70 = vector.shape_cast %69 : vector<1x32xf32> to vector<1x1x32xf32>
    %71 = vector.broadcast %70 : vector<1x1x32xf32> to vector<2x8x32xf32>
    %72 = arith.mulf %68, %71 : vector<2x8x32xf32>
    %73 = arith.addf %66, %72 : vector<2x8x32xf32>
    %c0_42 = arith.constant 0 : index
    %c0_43 = arith.constant 0 : index
    %c2_44 = arith.constant 2 : index
    %c0_45 = arith.constant 0 : index
    %74 = vector.load %arg8[%c0_42, %c0_43, %c2_44, %c0_45] : memref<2x2x16x32xf32, #tpu.memory_space<vmem>>, vector<1x2x8x32xf32>
    %75 = vector.shape_cast %74 : vector<1x2x8x32xf32> to vector<2x8x32xf32>
    %c4 = arith.constant 4 : index
    %c0_46 = arith.constant 0 : index
    %76 = vector.load %arg4[%c4, %c0_46] : memref<9x32xf32, #tpu.memory_space<vmem>>, vector<1x32xf32>
    %77 = vector.shape_cast %76 : vector<1x32xf32> to vector<1x1x32xf32>
    %78 = vector.broadcast %77 : vector<1x1x32xf32> to vector<2x8x32xf32>
    %79 = arith.mulf %75, %78 : vector<2x8x32xf32>
    %80 = arith.addf %73, %79 : vector<2x8x32xf32>
    %c1_47 = arith.constant 1 : index
    %c0_48 = arith.constant 0 : index
    %c2_49 = arith.constant 2 : index
    %c0_50 = arith.constant 0 : index
    %81 = vector.load %arg8[%c1_47, %c0_48, %c2_49, %c0_50] : memref<2x2x16x32xf32, #tpu.memory_space<vmem>>, vector<1x2x8x32xf32>
    %82 = vector.shape_cast %81 : vector<1x2x8x32xf32> to vector<2x8x32xf32>
    %c5 = arith.constant 5 : index
    %c0_51 = arith.constant 0 : index
    %83 = vector.load %arg4[%c5, %c0_51] : memref<9x32xf32, #tpu.memory_space<vmem>>, vector<1x32xf32>
    %84 = vector.shape_cast %83 : vector<1x32xf32> to vector<1x1x32xf32>
    %85 = vector.broadcast %84 : vector<1x1x32xf32> to vector<2x8x32xf32>
    %86 = arith.mulf %82, %85 : vector<2x8x32xf32>
    %87 = arith.addf %80, %86 : vector<2x8x32xf32>
    %c0_52 = arith.constant 0 : index
    %c0_53 = arith.constant 0 : index
    %c3_54 = arith.constant 3 : index
    %c0_55 = arith.constant 0 : index
    %88 = vector.load %arg8[%c0_52, %c0_53, %c3_54, %c0_55] : memref<2x2x16x32xf32, #tpu.memory_space<vmem>>, vector<1x2x8x32xf32>
    %89 = vector.shape_cast %88 : vector<1x2x8x32xf32> to vector<2x8x32xf32>
    %c6 = arith.constant 6 : index
    %c0_56 = arith.constant 0 : index
    %90 = vector.load %arg4[%c6, %c0_56] : memref<9x32xf32, #tpu.memory_space<vmem>>, vector<1x32xf32>
    %91 = vector.shape_cast %90 : vector<1x32xf32> to vector<1x1x32xf32>
    %92 = vector.broadcast %91 : vector<1x1x32xf32> to vector<2x8x32xf32>
    %93 = arith.mulf %89, %92 : vector<2x8x32xf32>
    %94 = arith.addf %87, %93 : vector<2x8x32xf32>
    %c1_57 = arith.constant 1 : index
    %c0_58 = arith.constant 0 : index
    %c3_59 = arith.constant 3 : index
    %c0_60 = arith.constant 0 : index
    %95 = vector.load %arg8[%c1_57, %c0_58, %c3_59, %c0_60] : memref<2x2x16x32xf32, #tpu.memory_space<vmem>>, vector<1x2x8x32xf32>
    %96 = vector.shape_cast %95 : vector<1x2x8x32xf32> to vector<2x8x32xf32>
    %c7 = arith.constant 7 : index
    %c0_61 = arith.constant 0 : index
    %97 = vector.load %arg4[%c7, %c0_61] : memref<9x32xf32, #tpu.memory_space<vmem>>, vector<1x32xf32>
    %98 = vector.shape_cast %97 : vector<1x32xf32> to vector<1x1x32xf32>
    %99 = vector.broadcast %98 : vector<1x1x32xf32> to vector<2x8x32xf32>
    %100 = arith.mulf %96, %99 : vector<2x8x32xf32>
    %101 = arith.addf %94, %100 : vector<2x8x32xf32>
    %c0_62 = arith.constant 0 : index
    %c0_63 = arith.constant 0 : index
    %c4_64 = arith.constant 4 : index
    %c0_65 = arith.constant 0 : index
    %102 = vector.load %arg8[%c0_62, %c0_63, %c4_64, %c0_65] : memref<2x2x16x32xf32, #tpu.memory_space<vmem>>, vector<1x2x8x32xf32>
    %103 = vector.shape_cast %102 : vector<1x2x8x32xf32> to vector<2x8x32xf32>
    %c8 = arith.constant 8 : index
    %c0_66 = arith.constant 0 : index
    %104 = vector.load %arg4[%c8, %c0_66] : memref<9x32xf32, #tpu.memory_space<vmem>>, vector<1x32xf32>
    %105 = vector.shape_cast %104 : vector<1x32xf32> to vector<1x1x32xf32>
    %106 = vector.broadcast %105 : vector<1x1x32xf32> to vector<2x8x32xf32>
    %107 = arith.mulf %103, %106 : vector<2x8x32xf32>
    %108 = arith.addf %101, %107 : vector<2x8x32xf32>
    %c0_67 = arith.constant 0 : index
    %c0_68 = arith.constant 0 : index
    %c0_69 = arith.constant 0 : index
    %109 = vector.load %arg5[%c0_67, %c0_68, %c0_69] : memref<2x8x32xf32, #tpu.memory_space<vmem>>, vector<2x8x32xf32>
    tpu.vector_store %arg5[%c0_67, %c0_68, %c0_69], %108 {strides = array<i32>} : memref<2x8x32xf32, #tpu.memory_space<vmem>>, vector<2x8x32xf32>,
    %cst_70 = arith.constant dense<0.000000e+00> : vector<8x32xf32>
    %110 = vector.multi_reduction <add>, %108, %cst_70 [0] : vector<2x8x32xf32> to vector<8x32xf32>
    %cst_71 = arith.constant dense<0.000000e+00> : vector<32xf32>
    %111 = vector.multi_reduction <add>, %110, %cst_71 [0] : vector<8x32xf32> to vector<32xf32>
    %112 = vector.shape_cast %111 : vector<32xf32> to vector<1x32xf32>
    %cst_72 = arith.constant 6.250000e-02 : f32
    %113 = vector.broadcast %cst_72 : f32 to vector<1x32xf32>
    %114 = arith.mulf %112, %113 : vector<1x32xf32>
    %115 = vector.shape_cast %114 : vector<1x32xf32> to vector<1x1x32xf32>
    %116 = vector.broadcast %115 : vector<1x1x32xf32> to vector<2x8x32xf32>
    %117 = arith.subf %108, %116 : vector<2x8x32xf32>
    %118 = arith.mulf %117, %117 : vector<2x8x32xf32>
    %cst_73 = arith.constant dense<0.000000e+00> : vector<8x32xf32>
    %119 = vector.multi_reduction <add>, %118, %cst_73 [0] : vector<2x8x32xf32> to vector<8x32xf32>
    %cst_74 = arith.constant dense<0.000000e+00> : vector<32xf32>
    %120 = vector.multi_reduction <add>, %119, %cst_74 [0] : vector<8x32xf32> to vector<32xf32>
    %121 = vector.shape_cast %120 : vector<32xf32> to vector<1x32xf32>
    %122 = vector.shape_cast %114 : vector<1x32xf32> to vector<1x1x32xf32>
    %c0_75 = arith.constant 0 : index
    %c0_76 = arith.constant 0 : index
    %c0_77 = arith.constant 0 : index
    %123 = vector.load %arg6[%c0_75, %c0_76, %c0_77] : memref<1x1x32xf32, #tpu.memory_space<vmem>>, vector<1x1x32xf32>
    tpu.vector_store %arg6[%c0_75, %c0_76, %c0_77], %122 {strides = array<i32>} : memref<1x1x32xf32, #tpu.memory_space<vmem>>, vector<1x1x32xf32>,
    %124 = vector.shape_cast %121 : vector<1x32xf32> to vector<1x1x32xf32>
    %c0_78 = arith.constant 0 : index
    %c0_79 = arith.constant 0 : index
    %c0_80 = arith.constant 0 : index
    %125 = vector.load %arg7[%c0_78, %c0_79, %c0_80] : memref<1x1x32xf32, #tpu.memory_space<vmem>>, vector<1x1x32xf32>
    tpu.vector_store %arg7[%c0_78, %c0_79, %c0_80], %124 {strides = array<i32>} : memref<1x1x32xf32, #tpu.memory_space<vmem>>, vector<1x1x32xf32>,
    return
  }
  func.func @transform_0(%arg0: i32) -> (i32, i32, i32, i32) {
    %c0_i32 = arith.constant 0 : i32
    %c0_i32_0 = arith.constant 0 : i32
    %c0_i32_1 = arith.constant 0 : i32
    %c0_i32_2 = arith.constant 0 : i32
    return %arg0, %c0_i32, %c0_i32_0, %c0_i32_1 : i32, i32, i32, i32
  }
  func.func @transform_1(%arg0: i32) -> (i32, i32) {
    %c0_i32 = arith.constant 0 : i32
    %c0_i32_0 = arith.constant 0 : i32
    %c0_i32_1 = arith.constant 0 : i32
    return %c0_i32, %c0_i32_0 : i32, i32
  }
  func.func @transform_2(%arg0: i32) -> (i32, i32) {
    %c0_i32 = arith.constant 0 : i32
    %c0_i32_0 = arith.constant 0 : i32
    %c0_i32_1 = arith.constant 0 : i32
    return %c0_i32, %c0_i32_0 : i32, i32
  }
  func.func @transform_3(%arg0: i32) -> (i32, i32) {
    %c0_i32 = arith.constant 0 : i32
    %c0_i32_0 = arith.constant 0 : i32
    %c0_i32_1 = arith.constant 0 : i32
    return %c0_i32, %c0_i32_0 : i32, i32
  }
  func.func @transform_4(%arg0: i32) -> (i32, i32, i32) {
    %c0_i32 = arith.constant 0 : i32
    %c0_i32_0 = arith.constant 0 : i32
    %c0_i32_1 = arith.constant 0 : i32
    return %arg0, %c0_i32, %c0_i32_0 : i32, i32, i32
  }
  func.func @transform_5(%arg0: i32) -> (i32, i32, i32) {
    %c0_i32 = arith.constant 0 : i32
    %c0_i32_0 = arith.constant 0 : i32
    %c0_i32_1 = arith.constant 0 : i32
    return %arg0, %c0_i32, %c0_i32_0 : i32, i32, i32
  }
  func.func @transform_6(%arg0: i32) -> (i32, i32, i32) {
    %c0_i32 = arith.constant 0 : i32
    %c0_i32_0 = arith.constant 0 : i32
    %c0_i32_1 = arith.constant 0 : i32
    return %arg0, %c0_i32, %c0_i32_0 : i32, i32, i32
  }
}

</mosaic_0001>

<bundles_post_ra>
// kernel: tpu_custom_call.1
= control target key start
LH: loop header
LB: loop body
LE: loop exit
PB: predicated region body
PF: predicated region fallthrough
CT: control target
= control target key end

     0   :  { %12 = vsyncpa [#allocation4], 0  ;;  %vm60_vm0 = vcmask 1043456   ;;  %vm35_vm1 = vcmask 31744   ;;  %s568_s0 = inlined_call_operand.vmem [shape: f32[2,2,16,4], index: 0, kind: input, shape index: {}]   ;;  %s569_s1 = inlined_call_operand.vmem [shape: f32[4,32], index: 1, kind: input, shape index: {}]   ;;  %s570_s2 = inlined_call_operand.vmem [shape: f32[1,32], index: 2, kind: input, shape index: {}]   ;;  %s571_s3 = inlined_call_operand.vmem [shape: f32[9,32], index: 3, kind: input, shape index: {}]   ;;  %s572_s4 = inlined_call_operand.hbm [shape: f32[2,8,32], index: 4, kind: output, shape index: {0}]   ;;  %s573_s5 = inlined_call_operand.hbm [shape: f32[1,1,32], index: 5, kind: output, shape index: {1}]   ;;  %s574_s6 = inlined_call_operand.hbm [shape: f32[1,1,32], index: 6, kind: output, shape index: {2}]  }
   0x1   :  { %v30_v0 = vld [vmem:[%s569_s1] sm:$0xf]  ;;  %v24_v2 = vld [vmem:[%s568_s0 + $0x10] sm:$0xff] }
   0x2   :  { %v22_v1 = vld [vmem:[%s568_s0] sm:$0xff]  ;;  %301 = vmatpush.msk.msra.mxu0 %vm60_vm0, %v30_v0  ;;  %310 = vmatpush.msk.msra.mxu1 %vm60_vm0, %v30_v0  ;;  %v28_v4 = vld [vmem:[%s568_s0 + $0x30] sm:$0xff] }
   0x3   :  { %v26_v3 = vld [vmem:[%s568_s0 + $0x20] sm:$0xff]  ;;  %311 = vmatpush.msk.msra.mxu2 %vm60_vm0, %v30_v0  ;;  %312 = vmatpush.msk.msra.mxu3 %vm60_vm0, %v30_v0 }
   0x4   :  { %302 = vmatmul.msk.f32.vlgmr.msra.gmra.mxu0 %vm35_vm1, %v22_v1  ;;  %304 = vmatmul.msk.f32.vlgmr.msra.gmra.mxu1 %vm35_vm1, %v24_v2 }
   0x5   :  { %13 = vsyncpa [#allocation6], 0  ;;  %306 = vmatmul.msk.f32.vlgmr.msra.gmra.mxu2 %vm35_vm1, %v26_v3  ;;  %308 = vmatmul.msk.f32.vlgmr.msra.gmra.mxu3 %vm35_vm1, %v28_v4  ;;  %v23_v5 = vld [vmem:[%s568_s0 + $0x8] sm:$0xff]  ;;  %v25_v6 = vld [vmem:[%s568_s0 + $0x18] sm:$0xff]  ;;  %v105_v9 = vlaneseq  ;;  %vm124_vm8 = vcmask 261120   ;;  %s258_s10 = sshll.u32 %s572_s4, 4  ;;  %s259_s10 = int_to_ptr.hbm [resolvable:$true] %s258_s10 }
   0x6   :  { %v27_v7 = vld [vmem:[%s568_s0 + $0x28] sm:$0xff]  ;;  %v29_v8 = vld [vmem:[%s568_s0 + $0x38] sm:$0xff]  ;;  %v318_v14 = vld [vmem:[%s570_s2] ss:$0 sm:$0xff]  ;;  %s405_s11 = smov 128   ;;  %s406_s12 = smov 8  }
   0x7   :  { %v106_v10 = vshrl.u32 %v105_v9, 7  ;;  %v319_v37 = vld [vmem:[%s571_s3] ss:$0 sm:$0xff]  ;;  %v320_v40 = vld [vmem:[%s571_s3 + $0x1] ss:$0 sm:$0xff]  ;;  %s407_s4 = smov [#allocation5]  }
   0x8   :  { %v321_v49 = vld [vmem:[%s571_s3 + $0x2] ss:$0 sm:$0xff]  ;;  %v322_v53 = vld [vmem:[%s571_s3 + $0x3] ss:$0 sm:$0xff]  ;;  %v323_v59 = vld [vmem:[%s571_s3 + $0x4] ss:$0 sm:$0xff] }
   0x9   :  { %v108_v11 = vmul.u32 2, %v106_v10  ;;  %v107_v13 = vadd.s32 8, %v106_v10  ;;  %v324_v1 = vld [vmem:[%s571_s3 + $0x5] ss:$0 sm:$0xff]  ;;  %s270_s13 = sshll.u32 %s407_s4, 4  ;;  %s272_s0 = sshll.u32 %s573_s5, 4  ;;  %s271_s13 = int_to_ptr.vmem [resolvable:$true] %s270_s13  ;;  %s273_s0 = int_to_ptr.hbm [resolvable:$true] %s272_s0 }
   0xa   :  { %vm249_vm15 = vcmask 253952   ;;  %s408_s5 = smov [#allocation7]   ;;  %s283_s18 = sshll.u32 %s574_s6, 4  ;;  %s284_s18 = int_to_ptr.hbm [resolvable:$true] %s283_s18 }
   0xb   :  { %v129_v12 = vadd.s32 1, %v108_v11  ;;  %vm110_vm2 = vcmp.ge.s32.totalorder %v108_v11, 4  ;;  %vm112_vm3 = vcmp.lt.s32.totalorder %v108_v11, 20  ;;  %v109_v15 = vmul.u32 2, %v107_v13  ;;  %v326_v13 = vld [vmem:[%s571_s3 + $0x7] ss:$0 sm:$0xff] }
   0xc   :  { %303 = vmatmul.msk.f32.gmra.mxu0 %vm35_vm1, %v23_v5  ;;  %305 = vmatmul.msk.f32.gmra.mxu1 %vm35_vm1, %v25_v6  ;;  %vm482_vm6 = vmand %vm110_vm2, %vm112_vm3  ;;  %v325_v5 = vld [vmem:[%s571_s3 + $0x6] ss:$0 sm:$0xff]  ;;  %s281_s2 = sshll.u32 %s408_s5, 4  ;;  %s282_s2 = int_to_ptr.vmem [resolvable:$true] %s281_s2 }
   0xd   :  { %307 = vmatmul.msk.f32.gmra.mxu2 %vm35_vm1, %v27_v7  ;;  %309 = vmatmul.msk.f32.gmra.mxu3 %vm35_vm1, %v29_v8  ;;  %vm131_vm4 = vcmp.ge.s32.totalorder %v129_v12, 4  ;;  %vm133_vm5 = vcmp.lt.s32.totalorder %v129_v12, 20  ;;  %v130_v22 = vadd.s32 1, %v109_v15  ;;  %vm111_vm9 = vcmp.ge.s32.totalorder %v109_v15, 4 }
   0xe   :  { %vm486_vm7 = vmand %vm131_vm4, %vm133_vm5  ;;  %vm113_vm10 = vcmp.lt.s32.totalorder %v109_v15, 20 }
   0xf   :  { %vm132_vm11 = vcmp.ge.s32.totalorder %v130_v22, 4  ;;  %vm134_vm12 = vcmp.lt.s32.totalorder %v130_v22, 20  ;;  %vm496_vm13 = vmand %vm111_vm9, %vm113_vm10 }
  0x10   :  { %vm500_vm14 = vmand %vm132_vm11, %vm134_vm12 }
  0x81   :  { %v81_v17 = vpop.f32.mrf.mxu0  ;;  %v87_v18 = vpop.f32.mrf.mxu1 }
  0x82   :  { %v82_v20 = vadd.f32 %v318_v14, %v81_v17  ;;  %v88_v21 = vadd.f32 %v318_v14, %v87_v18 }
  0x84   :  { %v120_v23 = vsel %vm482_vm6, %v82_v20, 0.0  ;;  %v141_v24 = vsel %vm486_vm7, %v88_v21, 0.0  ;;  %v327_v20 = vld [vmem:[%s571_s3 + $0x8] ss:$0 sm:$0xff]  ;;  %s404_s3 = smov [#allocation3]  }
  0x85   :  { %125 = vst.msk [vmem:[#allocation2] sm:$0xff] %vm124_vm8, %v120_v23  ;;  %s256_s7 = sshll.u32 %s404_s3, 4  ;;  %s257_s7 = int_to_ptr.vmem [resolvable:$true] %s256_s7 }
  0x86   :  { %146 = vst.msk [vmem:[#allocation2 + $0x20] sm:$0xff] %vm124_vm8, %v141_v24 }
  0x88   :  { %v93_v25 = vpop.f32.mrf.mxu2  ;;  %v99_v26 = vpop.f32.mrf.mxu3 }
  0x89   :  { %v94_v28 = vadd.f32 %v318_v14, %v93_v25  ;;  %v100_v29 = vadd.f32 %v318_v14, %v99_v26  ;;  %v84_v30 = vpop.f32.mrf.mxu0  ;;  %v90_v31 = vpop.f32.mrf.mxu1 }
  0x8a   :  { %v85_v33 = vadd.f32 %v318_v14, %v84_v30  ;;  %v91_v34 = vadd.f32 %v318_v14, %v90_v31 }
  0x8b   :  { %v122_v35 = vsel %vm482_vm6, %v94_v28, 0.0  ;;  %v143_v36 = vsel %vm486_vm7, %v100_v29, 0.0 }
  0x8c   :  { %127 = vst.msk [vmem:[#allocation2 + $0x10] sm:$0xff] %vm124_vm8, %v122_v35  ;;  %v121_v38 = vsel %vm496_vm13, %v85_v33, 0.0  ;;  %v142_v39 = vsel %vm500_vm14, %v91_v34, 0.0  ;;  %v150_v41 = vld [vmem:[#allocation2] sm:$0xff] }
  0x8d   :  { %148 = vst.msk [vmem:[#allocation2 + $0x30] sm:$0xff] %vm124_vm8, %v143_v36  ;;  %v158_v42 = vld [vmem:[#allocation2 + $0x20] sm:$0xff]  ;;  %v154_v45 = vmul.f32 %v319_v37, %v150_v41 }
  0x8e   :  { %126 = vst.msk [vmem:[#allocation2 + $0x8] sm:$0xff] %vm124_vm8, %v121_v38  ;;  %v162_v46 = vmul.f32 %v320_v40, %v158_v42 }
  0x8f   :  { %147 = vst.msk [vmem:[#allocation2 + $0x28] sm:$0xff] %vm124_vm8, %v142_v39 }
  0x90   :  { %v96_v43 = vpop.f32.mrf.mxu2  ;;  %v102_v44 = vpop.f32.mrf.mxu3  ;;  %v164_v52 = vadd.f32 %v162_v46, %v154_v45 }
  0x91   :  { %v97_v47 = vadd.f32 %v318_v14, %v96_v43  ;;  %v103_v48 = vadd.f32 %v318_v14, %v102_v44 }
  0x93   :  { %v123_v50 = vsel %vm496_vm13, %v97_v47, 0.0  ;;  %v144_v51 = vsel %vm500_vm14, %v103_v48, 0.0  ;;  %v151_v54 = vld [vmem:[#allocation2 + $0x10] sm:$0xff] }
  0x94   :  { %128 = vst.msk [vmem:[#allocation2 + $0x18] sm:$0xff] %vm124_vm8, %v123_v50  ;;  %v159_v55 = vld [vmem:[#allocation2 + $0x30] sm:$0xff]  ;;  %v155_v61 = vmul.f32 %v319_v37, %v151_v54 }
  0x95   :  { %149 = vst.msk [vmem:[#allocation2 + $0x38] sm:$0xff] %vm124_vm8, %v144_v51  ;;  %v166_v56 = vld [vmem:[#allocation2 + $0x1] sm:$0xff]  ;;  %v163_v62 = vmul.f32 %v320_v40, %v159_v55 }
  0x96   :  { %v170_v57 = vmul.f32 %v321_v49, %v166_v56  ;;  %v174_v58 = vld [vmem:[#allocation2 + $0x21] sm:$0xff] }
  0x97   :  { %v182_v60 = vld [vmem:[#allocation2 + $0x2] sm:$0xff]  ;;  %v178_v0 = vmul.f32 %v322_v53, %v174_v58  ;;  %v165_v8 = vadd.f32 %v163_v62, %v155_v61 }
  0x98   :  { %v172_v63 = vadd.f32 %v170_v57, %v164_v52  ;;  %v190_v2 = vld [vmem:[#allocation2 + $0x22] sm:$0xff]  ;;  %v186_v4 = vmul.f32 %v323_v59, %v182_v60 }
  0x99   :  { %v198_v7 = vld [vmem:[#allocation2 + $0x3] sm:$0xff]  ;;  %v194_v12 = vmul.f32 %v324_v1, %v190_v2 }
  0x9a   :  { %v180_v3 = vadd.f32 %v178_v0, %v172_v63  ;;  %v206_v15 = vld [vmem:[#allocation2 + $0x23] sm:$0xff]  ;;  %v202_v19 = vmul.f32 %v325_v5, %v198_v7 }
  0x9b   :  { %v167_v6 = vld [vmem:[#allocation2 + $0x11] sm:$0xff]  ;;  %v214_v22 = vld [vmem:[#allocation2 + $0x4] sm:$0xff]  ;;  %v210_v26 = vmul.f32 %v326_v13, %v206_v15 }
  0x9c   :  { %v171_v9 = vmul.f32 %v321_v49, %v167_v6  ;;  %v175_v10 = vld [vmem:[#allocation2 + $0x31] sm:$0xff]  ;;  %v188_v11 = vadd.f32 %v186_v4, %v180_v3  ;;  %v218_v31 = vmul.f32 %v327_v20, %v214_v22 }
  0x9d   :  { %v183_v14 = vld [vmem:[#allocation2 + $0x12] sm:$0xff]  ;;  %v179_v17 = vmul.f32 %v322_v53, %v175_v10 }
  0x9e   :  { %v173_v16 = vadd.f32 %v171_v9, %v165_v8  ;;  %v196_v18 = vadd.f32 %v194_v12, %v188_v11  ;;  %v191_v21 = vld [vmem:[#allocation2 + $0x32] sm:$0xff]  ;;  %v187_v24 = vmul.f32 %v323_v59, %v183_v14 }
  0x9f   :  { %v199_v27 = vld [vmem:[#allocation2 + $0x13] sm:$0xff]  ;;  %v195_v29 = vmul.f32 %v324_v1, %v191_v21 }
  0xa0   :  { %v181_v23 = vadd.f32 %v179_v17, %v173_v16  ;;  %v204_v25 = vadd.f32 %v202_v19, %v196_v18  ;;  %v207_v32 = vld [vmem:[#allocation2 + $0x33] sm:$0xff]  ;;  %v203_v34 = vmul.f32 %v325_v5, %v199_v27 }
  0xa1   :  { %v215_v36 = vld [vmem:[#allocation2 + $0x14] sm:$0xff]  ;;  %v211_v38 = vmul.f32 %v326_v13, %v207_v32 }
  0xa2   :  { %v189_v28 = vadd.f32 %v187_v24, %v181_v23  ;;  %v212_v30 = vadd.f32 %v210_v26, %v204_v25  ;;  %v219_v40 = vmul.f32 %v327_v20, %v215_v36 }
  0xa4   :  { %v197_v33 = vadd.f32 %v195_v29, %v189_v28  ;;  %v220_v35 = vadd.f32 %v218_v31, %v212_v30 }
  0xa6   :  { %v205_v37 = vadd.f32 %v203_v34, %v197_v33  ;;  %222 = vst.msk [vmem:[#allocation3] sm:$0xff] %vm124_vm8, %v220_v35  ;;  %v224_v42 = vsel %vm124_vm8, %v220_v35, 0.0 }
  0xa8   :  { %v213_v39 = vadd.f32 %v211_v38, %v205_v37 }
  0xaa   :  { %v221_v41 = vadd.f32 %v219_v40, %v213_v39 }
  0xac   :  { %v225_v43 = vsel %vm124_vm8, %v221_v41, 0.0  ;;  %223 = vst.msk [vmem:[#allocation3 + $0x8] sm:$0xff] %vm124_vm8, %v221_v41 }
  0xad   :  { %v226_v44 = vadd.f32 %v225_v43, %v224_v42  ;;  %264 = dma.vmem_to_hbm [thread:$0]  %s257_s7, 256, %s259_s10, [#allocation4], %s405_s11, %s405_s11, %s406_s12  }
  0xaf   :  { %v227_v45 = vsel %vm124_vm8, %v226_v44, 0.0 }
  0xb0   :  { %v228_v46 = vrot.slane %v227_v45, 4 }
  0xb2   :  { %v229_v47 = vadd.f32 %v228_v46, %v227_v45 }
  0xb4   :  { %v230_v48 = vrot.slane %v229_v47, 2 }
  0xb6   :  { %v231_v49 = vadd.f32 %v230_v48, %v229_v47 }
  0xb8   :  { %v232_v50 = vrot.slane %v231_v49, 1 }
  0xba   :  { %v233_v51 = vadd.f32 %v232_v50, %v231_v49 }
  0xbc   :  { %v234_v52 = vmul.f32 0.0625, %v233_v51 }
  0xbe   :  { %v235_v53 = vsub.f32 %v220_v35, %v234_v52  ;;  %v236_v54 = vsub.f32 %v221_v41, %v234_v52  ;;  %250 = vst.msk [vmem:[#allocation5] sm:$0x1] %vm249_vm15, %v234_v52 }
  0xbf   :  { %275 = dma.vmem_to_hbm [thread:$0]  %s271_s13, 16, %s273_s0, [#allocation6]  }
  0xc0   :  { %v237_v55 = vmul.f32 %v235_v53, %v235_v53  ;;  %v238_v56 = vmul.f32 %v236_v54, %v236_v54 }
  0xc2   :  { %v239_v57 = vsel %vm124_vm8, %v237_v55, 0.0  ;;  %v240_v58 = vsel %vm124_vm8, %v238_v56, 0.0 }
  0xc3   :  { %v241_v59 = vadd.f32 %v240_v58, %v239_v57 }
  0xc5   :  { %v242_v60 = vsel %vm124_vm8, %v241_v59, 0.0 }
  0xc6   :  { %v243_v61 = vrot.slane %v242_v60, 4 }
  0xc8   :  { %v244_v62 = vadd.f32 %v243_v61, %v242_v60 }
  0xca   :  { %v245_v63 = vrot.slane %v244_v62, 2 }
  0xcc   :  { %v246_v0 = vadd.f32 %v245_v63, %v244_v62 }
  0xce   :  { %v247_v1 = vrot.slane %v246_v0, 1 }
  0xd0   :  { %v248_v2 = vadd.f32 %v247_v1, %v246_v0 }
  0xd2   :  { %251 = vst.msk [vmem:[#allocation7] sm:$0x1] %vm249_vm15, %v248_v2 }
  0xd3   :  { %286 = dma.vmem_to_hbm [thread:$0]  %s282_s2, 16, %s284_s18, [#allocation6]  }
  0xd4   :  { %400 = dma.done.wait [#allocation4], 256  }
  0xd5   :  { %401 = vsyncadd [#allocation4], 4294967040 }
  0xd6   :  { %402 = dma.done.wait [#allocation6], 32  }
  0xd7   :  { %403 = vsyncadd [#allocation6], 4294967264 }
  0xd8   :  { %299 = vsyncpa [#allocation4], 1 }
  0xd9   :  { %300 = vsyncpa [#allocation6], 1 }

</bundles_post_ra>
